<compile_context>
chip_gen: v7x
topology: tpu7x:2x2x1
jax: 0.10.0
libtpu: 0.0.40
codegen_flags: <defaults>
</compile_context>

<pallas_src>
import jax
import jax.numpy as jnp
from jax import lax
from jax.experimental import pallas as pl
from jax.experimental.pallas import tpu as pltpu

# ----- model / problem sizes (small, consistent with the module) -----
VOCAB = 50        # vocab_size
EMBED = 32        # embed_size
HIDDEN = 32       # hidden_size
NUM_OUT = 8       # num_output
B = 4             # batch
T = 8             # max sequence length
EPS = 1e-5        # BatchNorm1d eps

B_PAD = 8         # pad batch to a full sublane group
NUM_OUT_PAD = 128  # pad FC output to a full lane group (unmasked vst)


def rnn_kernel(x2d_ref,     # (T*B_PAD, E)   time-major flattened embedded input
               xlast_ref,   # (B_PAD, E)     x[b, len_b-1]  (backward-dir input)
               cap_ref,     # (T*B_PAD, H)   1.0 where t == len_b-1 else 0.0
               wih_f_ref,   # (E, 4H)  forward  W_ih^T, gate order (i,f,o,g)
               whh_f_ref,   # (H, 4H)  forward  W_hh^T, gate order (i,f,o,g)
               b_f_ref,     # (1, 4H)  forward  b_ih + b_hh
               wih_b_ref,   # (E, 4H)  backward W_ih^T, gate order (i,f,o,g)
               b_b_ref,     # (1, 4H)  backward b_ih + b_hh
               fcw_ref,     # (2H, NUM_OUT_PAD)  BN-folded fc weight^T (zero-padded)
               fcb_ref,     # (1, NUM_OUT_PAD)   BN-folded fc bias     (zero-padded)
               out_ref,     # (B_PAD, NUM_OUT_PAD)
               xw_ref):     # scratch: (T*B_PAD, 4H) hoisted input projection
    H = HIDDEN

    # ---- prologue: hoisted input projection, ONE matmul for all timesteps,
    #      bias folded in so the serial loop has no broadcasts.
    xw_ref[...] = (jnp.dot(x2d_ref[...], wih_f_ref[...],
                           preferred_element_type=jnp.float32) + b_f_ref[...])

    # ---- backward direction: zero initial state, so the packed backward output
    #      at t = len-1 is ONE cell step on x[b, len-1] (no recurrent matmul).
    gb = (jnp.dot(xlast_ref[...], wih_b_ref[...],
                  preferred_element_type=jnp.float32) + b_b_ref[...])
    sb = jax.nn.sigmoid(gb[:, :3 * H])            # i|f|o  (lanes [0:96))
    gtb = jnp.tanh(gb[:, 3 * H:])                 # g      (lanes [96:128))
    h_bwd = sb[:, 2 * H:3 * H] * jnp.tanh(sb[:, :H] * gtb)   # c0=0 -> c = i*g

    # ---- forward recurrence (serial critical path): per step one
    #      (B_PAD,H)@(H,4H) matmul + two full-width EUP calls + gate math.
    whh_f = whh_f_ref[...]

    def step(t, carry):
        h, c, h_out = carry
        base = pl.multiple_of(t * B_PAD, B_PAD)   # sublane-aligned dynamic slice
        gates = xw_ref[pl.ds(base, B_PAD), :] + jnp.dot(
            h, whh_f, preferred_element_type=jnp.float32)
        s = jax.nn.sigmoid(gates[:, :3 * H])      # i|f|o in one EUP pass
        g = jnp.tanh(gates[:, 3 * H:])            # g in one EUP pass
        c = s[:, H:2 * H] * c + s[:, :H] * g
        h = s[:, 2 * H:3 * H] * jnp.tanh(c)
        cap = cap_ref[pl.ds(base, B_PAD), :]      # precomputed capture mask
        h_out = h_out + cap * (h - h_out)         # capture h at t == len-1
        return h, c, h_out

    zeros = jnp.zeros((B_PAD, H), jnp.float32)
    _, _, h_fwd = lax.fori_loop(0, T, step, (zeros, zeros, zeros), unroll=True)

    # ---- epilogue: BN already folded into fcw/fcb (wrapper); split the 2H
    #      contraction into directional halves to avoid an in-kernel concat.
    fcw = fcw_ref[...]
    out_ref[...] = (jnp.dot(h_fwd, fcw[:H, :], preferred_element_type=jnp.float32)
                    + jnp.dot(h_bwd, fcw[H:, :], preferred_element_type=jnp.float32)
                    + fcb_ref[...])


def rnn_forward(x_ids, seq_lengths, params):
    """JAX wrapper: embedding lookup + weight prep (glue), Pallas kernel hot path."""
    H = HIDDEN
    lens = seq_lengths.astype(jnp.int32)
    # NOTE: all sequence lengths must be >= 1 (pack_padded_sequence would raise
    # on zero-length sequences anyway).

    # x.view(B, -1) -> embedding lookup; padding row is zero.
    x_embed = params["emb"][x_ids]                        # (B, T, E)
    # dropout p=0.6: identity in eval mode.

    # Backward-direction input: x at the last valid timestep of each sequence.
    x_last = x_embed[jnp.arange(B), lens - 1]             # (B, E)

    # Time-major, batch padded to a full sublane group, flattened for the
    # hoisted input projection.
    pad_b = B_PAD - B
    x_tbe = jnp.transpose(x_embed, (1, 0, 2))             # (T, B, E)
    x_tbe = jnp.pad(x_tbe, ((0, 0), (0, pad_b), (0, 0)))  # (T, B_PAD, E)
    x2d = x_tbe.reshape(T * B_PAD, EMBED)
    x_last_p = jnp.pad(x_last, ((0, pad_b), (0, 0)))      # (B_PAD, E)

    # Capture mask: 1.0 exactly at t == len-1 (padded rows get len=1; their
    # garbage output rows are sliced off below and feed no cross-batch math).
    lens_p = jnp.pad(lens, (0, pad_b), constant_values=1)
    cap = (jnp.arange(T, dtype=jnp.int32)[:, None]
           == (lens_p - 1)[None, :]).astype(jnp.float32)  # (T, B_PAD)
    cap = jnp.broadcast_to(cap[:, :, None], (T, B_PAD, H)).reshape(T * B_PAD, H)

    # Reorder gate columns (i, f, g, o) -> (i, f, o, g) so sigmoid hits lanes
    # [0:96) and tanh hits [96:128) contiguously inside the kernel.
    perm = jnp.concatenate([jnp.arange(0, 2 * H),
                            jnp.arange(3 * H, 4 * H),
                            jnp.arange(2 * H, 3 * H)])
    wih_f = params["wih_f"][perm].T                       # (E, 4H)
    whh_f = params["whh_f"][perm].T                       # (H, 4H)
    b_f = (params["bih_f"] + params["bhh_f"])[perm].reshape(1, 4 * H)
    wih_b = params["wih_b"][perm].T                       # (E, 4H)
    b_b = (params["bih_b"] + params["bhh_b"])[perm].reshape(1, 4 * H)
    # W_hh (backward) is not needed: zero initial state for the one-step
    # backward output at t = len-1.

    # Fold eval-mode BatchNorm1d (running stats) into the FC layer:
    #   BN(x) = x*scale + shift ; FC(BN(x)) = x @ (scale*W^T) + (shift@W^T + b)
    scale = params["bn_gamma"] * lax.rsqrt(params["bn_var"] + EPS)   # (2H,)
    shift = params["bn_beta"] - params["bn_mean"] * scale            # (2H,)
    fcw = params["fc_w"].T * scale[:, None]               # (2H, NUM_OUT)
    fcb = params["fc_b"] + shift @ params["fc_w"].T       # (NUM_OUT,)
    # Lane-dense output: pad the FC output dim to 128 for an unmasked store.
    fcw = jnp.pad(fcw, ((0, 0), (0, NUM_OUT_PAD - NUM_OUT)))
    fcb = jnp.pad(fcb, (0, NUM_OUT_PAD - NUM_OUT)).reshape(1, NUM_OUT_PAD)

    vmem = pl.BlockSpec(memory_space=pltpu.MemorySpace.VMEM)
    out = pl.pallas_call(
        rnn_kernel,
        out_shape=jax.ShapeDtypeStruct((B_PAD, NUM_OUT_PAD), jnp.float32),
        in_specs=[vmem] * 10,
        out_specs=vmem,
        scratch_shapes=[pltpu.VMEM((T * B_PAD, 4 * H), jnp.float32)],
    )(x2d, x_last_p, cap, wih_f, whh_f, b_f, wih_b, b_b, fcw, fcb)
    return out[:B, :NUM_OUT]


rnn_forward = jax.jit(rnn_forward)


def reference_forward(x_ids, seq_lengths, params):
    """Pure-JAX reference with identical semantics (sanity check)."""
    H = HIDDEN
    emb = params["emb"][x_ids]                            # (B, T, E)
    lens = seq_lengths.astype(jnp.int32)

    def cell(x_t, h, c, wih, whh, b):
        gates = x_t @ wih.T + h @ whh.T + b
        i = jax.nn.sigmoid(gates[:, :H])
        f = jax.nn.sigmoid(gates[:, H:2 * H])
        g = jnp.tanh(gates[:, 2 * H:3 * H])
        o = jax.nn.sigmoid(gates[:, 3 * H:])
        c = f * c + i * g
        h = o * jnp.tanh(c)
        return h, c

    h = jnp.zeros((B, H)); c = jnp.zeros((B, H)); x_last = jnp.zeros((B, EMBED))
    bf = params["bih_f"] + params["bhh_f"]
    bb = params["bih_b"] + params["bhh_b"]
    for t in range(T):
        x_t = emb[:, t, :]
        hn, cn = cell(x_t, h, c, params["wih_f"], params["whh_f"], bf)
        m = (t < lens)[:, None]
        h = jnp.where(m, hn, h)
        c = jnp.where(m, cn, c)
        x_last = jnp.where((t == lens - 1)[:, None], x_t, x_last)
    hb, _ = cell(x_last, jnp.zeros((B, H)), jnp.zeros((B, H)),
                 params["wih_b"], params["whh_b"], bb)
    last = jnp.concatenate([h, hb], axis=-1)
    y = ((last - params["bn_mean"]) / jnp.sqrt(params["bn_var"] + EPS)
         * params["bn_gamma"] + params["bn_beta"])
    return y @ params["fc_w"].T + params["fc_b"]


def init_params(key):
    H = HIDDEN
    ks = jax.random.split(key, 12)
    emb = 0.1 * jax.random.normal(ks[0], (VOCAB, EMBED), jnp.float32)
    emb = emb.at[0].set(0.0)                              # padding_idx = 0
    p = {
        "emb": emb,
        "wih_f": 0.1 * jax.random.normal(ks[1], (4 * H, EMBED), jnp.float32),
        "whh_f": 0.1 * jax.random.normal(ks[2], (4 * H, H), jnp.float32),
        "bih_f": 0.1 * jax.random.normal(ks[3], (4 * H,), jnp.float32),
        "bhh_f": 0.1 * jax.random.normal(ks[4], (4 * H,), jnp.float32),
        "wih_b": 0.1 * jax.random.normal(ks[5], (4 * H, EMBED), jnp.float32),
        "whh_b": 0.1 * jax.random.normal(ks[6], (4 * H, H), jnp.float32),
        "bih_b": 0.1 * jax.random.normal(ks[7], (4 * H,), jnp.float32),
        "bhh_b": 0.1 * jax.random.normal(ks[8], (4 * H,), jnp.float32),
        "bn_gamma": 1.0 + 0.1 * jax.random.normal(ks[9], (2 * H,), jnp.float32),
        "bn_beta": 0.1 * jax.random.normal(ks[10], (2 * H,), jnp.float32),
        "bn_mean": jnp.zeros((2 * H,), jnp.float32),      # BN running stats (init)
        "bn_var": jnp.ones((2 * H,), jnp.float32),
        "fc_w": 0.1 * jax.random.normal(ks[11], (NUM_OUT, 2 * H), jnp.float32),
        "fc_b": jnp.zeros((NUM_OUT,), jnp.float32),
    }
    return p


if __name__ == "__main__":
    key = jax.random.PRNGKey(0)
    pkey, xkey = jax.random.split(key)
    params = init_params(pkey)

    # lengths sorted descending (pack_padded_sequence enforce_sorted=True), all >= 1
    seq_lengths = jnp.array([8, 6, 5, 3], dtype=jnp.int32)
    x_ids = jax.random.randint(xkey, (B, T), 1, VOCAB, dtype=jnp.int32)
    # zero-out (padding token) positions beyond each sequence length
    t_iota = jnp.arange(T, dtype=jnp.int32)[None, :]
    x_ids = jnp.where(t_iota < seq_lengths[:, None], x_ids, 0)

    out = rnn_forward(x_ids, seq_lengths, params)
    out = jax.block_until_ready(out)

    ref = reference_forward(x_ids, seq_lengths, params)
    assert out.shape == (B, NUM_OUT)
    assert jnp.allclose(out, ref, atol=1e-4, rtol=1e-4), (out, ref)

    print("KERNEL_OK")
</pallas_src>

<mosaic_0001>
module attributes {stable_mosaic.version = 11 : i64} {
  func.func @rnn_kernel(%arg0: memref<64x32xf32, #tpu.memory_space<vmem>>, %arg1: memref<8x32xf32, #tpu.memory_space<vmem>>, %arg2: memref<64x32xf32, #tpu.memory_space<vmem>>, %arg3: memref<32x128xf32, #tpu.memory_space<vmem>>, %arg4: memref<32x128xf32, #tpu.memory_space<vmem>>, %arg5: memref<1x128xf32, #tpu.memory_space<vmem>>, %arg6: memref<32x128xf32, #tpu.memory_space<vmem>>, %arg7: memref<1x128xf32, #tpu.memory_space<vmem>>, %arg8: memref<64x128xf32, #tpu.memory_space<vmem>>, %arg9: memref<1x128xf32, #tpu.memory_space<vmem>>, %arg10: memref<8x128xf32, #tpu.memory_space<vmem>>, %arg11: memref<64x128xf32, #tpu.memory_space<vmem>>) attributes {dimension_semantics = [], scalar_prefetch = 0 : i64, scratch_operands = 1 : i64, tpu.core_type = #tpu.core_type<tc>} {
    %c0 = arith.constant 0 : index
    %c0_0 = arith.constant 0 : index
    %0 = vector.load %arg0[%c0, %c0_0] : memref<64x32xf32, #tpu.memory_space<vmem>>, vector<64x32xf32>
    %c0_1 = arith.constant 0 : index
    %c0_2 = arith.constant 0 : index
    %1 = vector.load %arg3[%c0_1, %c0_2] : memref<32x128xf32, #tpu.memory_space<vmem>>, vector<32x128xf32>
    %cst = arith.constant dense<0.000000e+00> : vector<64x128xf32>
    %2 = tpu.matmul %0, %1, %cst {dimension_numbers = #tpu.dot_dimension_numbers<[1], [0], [0], [1], [0, 0, 1, 1], [], []>} : vector<64x32xf32>, vector<32x128xf32>, vector<64x128xf32> -> vector<64x128xf32>
    %c0_3 = arith.constant 0 : index
    %c0_4 = arith.constant 0 : index
    %3 = vector.load %arg5[%c0_3, %c0_4] : memref<1x128xf32, #tpu.memory_space<vmem>>, vector<1x128xf32>
    %4 = vector.broadcast %3 : vector<1x128xf32> to vector<64x128xf32>
    %5 = arith.addf %2, %4 : vector<64x128xf32>
    %c0_5 = arith.constant 0 : index
    %c0_6 = arith.constant 0 : index
    %6 = vector.load %arg11[%c0_5, %c0_6] : memref<64x128xf32, #tpu.memory_space<vmem>>, vector<64x128xf32>
    tpu.vector_store %arg11[%c0_5, %c0_6], %5 {strides = array<i32>} : memref<64x128xf32, #tpu.memory_space<vmem>>, vector<64x128xf32>,
    %c0_7 = arith.constant 0 : index
    %c0_8 = arith.constant 0 : index
    %7 = vector.load %arg1[%c0_7, %c0_8] : memref<8x32xf32, #tpu.memory_space<vmem>>, vector<8x32xf32>
    %c0_9 = arith.constant 0 : index
    %c0_10 = arith.constant 0 : index
    %8 = vector.load %arg6[%c0_9, %c0_10] : memref<32x128xf32, #tpu.memory_space<vmem>>, vector<32x128xf32>
    %cst_11 = arith.constant dense<0.000000e+00> : vector<8x128xf32>
    %9 = tpu.matmul %7, %8, %cst_11 {dimension_numbers = #tpu.dot_dimension_numbers<[1], [0], [0], [1], [0, 0, 1, 1], [], []>} : vector<8x32xf32>, vector<32x128xf32>, vector<8x128xf32> -> vector<8x128xf32>
    %c0_12 = arith.constant 0 : index
    %c0_13 = arith.constant 0 : index
    %10 = vector.load %arg7[%c0_12, %c0_13] : memref<1x128xf32, #tpu.memory_space<vmem>>, vector<1x128xf32>
    %11 = vector.broadcast %10 : vector<1x128xf32> to vector<8x128xf32>
    %12 = arith.addf %9, %11 : vector<8x128xf32>
    %13 = vector.extract_strided_slice %12 {offsets = [0, 0], sizes = [8, 96], strides = [1, 1]} : vector<8x128xf32> to vector<8x96xf32>
    %14 = arith.negf %13 : vector<8x96xf32>
    %15 = math.exp %14 : vector<8x96xf32>
    %cst_14 = arith.constant 1.000000e+00 : f32
    %16 = vector.broadcast %cst_14 : f32 to vector<8x96xf32>
    %17 = arith.addf %16, %15 : vector<8x96xf32>
    %18 = arith.divf %16, %17 : vector<8x96xf32>
    %19 = vector.extract_strided_slice %12 {offsets = [0, 96], sizes = [8, 32], strides = [1, 1]} : vector<8x128xf32> to vector<8x32xf32>
    %20 = math.tanh %19 : vector<8x32xf32>
    %21 = vector.extract_strided_slice %18 {offsets = [0, 64], sizes = [8, 32], strides = [1, 1]} : vector<8x96xf32> to vector<8x32xf32>
    %22 = vector.extract_strided_slice %18 {offsets = [0, 0], sizes = [8, 32], strides = [1, 1]} : vector<8x96xf32> to vector<8x32xf32>
    %23 = arith.mulf %22, %20 : vector<8x32xf32>
    %24 = math.tanh %23 : vector<8x32xf32>
    %25 = arith.mulf %21, %24 : vector<8x32xf32>
    %c0_15 = arith.constant 0 : index
    %c0_16 = arith.constant 0 : index
    %26 = vector.load %arg4[%c0_15, %c0_16] : memref<32x128xf32, #tpu.memory_space<vmem>>, vector<32x128xf32>
    %cst_17 = arith.constant 0.000000e+00 : f32
    %27 = vector.broadcast %cst_17 : f32 to vector<8x32xf32>
    %c0_i32 = arith.constant 0 : i32
    %c8_i32 = arith.constant 8 : i32
    %28 = arith.muli %c0_i32, %c8_i32 : i32
    %29 = tpu.assume_multiple %28, 8 : i32
    %30 = arith.index_cast %29 : i32 to index
    %c0_18 = arith.constant 0 : index
    %31 = vector.load %arg11[%30, %c0_18] : memref<64x128xf32, #tpu.memory_space<vmem>>, vector<8x128xf32>
    %cst_19 = arith.constant dense<0.000000e+00> : vector<8x128xf32>
    %32 = tpu.matmul %27, %26, %cst_19 {dimension_numbers = #tpu.dot_dimension_numbers<[1], [0], [0], [1], [0, 0, 1, 1], [], []>} : vector<8x32xf32>, vector<32x128xf32>, vector<8x128xf32> -> vector<8x128xf32>
    %33 = arith.addf %31, %32 : vector<8x128xf32>
    %34 = vector.extract_strided_slice %33 {offsets = [0, 0], sizes = [8, 96], strides = [1, 1]} : vector<8x128xf32> to vector<8x96xf32>
    %35 = arith.negf %34 : vector<8x96xf32>
    %36 = math.exp %35 : vector<8x96xf32>
    %cst_20 = arith.constant 1.000000e+00 : f32
    %37 = vector.broadcast %cst_20 : f32 to vector<8x96xf32>
    %38 = arith.addf %37, %36 : vector<8x96xf32>
    %39 = arith.divf %37, %38 : vector<8x96xf32>
    %40 = vector.extract_strided_slice %33 {offsets = [0, 96], sizes = [8, 32], strides = [1, 1]} : vector<8x128xf32> to vector<8x32xf32>
    %41 = math.tanh %40 : vector<8x32xf32>
    %42 = vector.extract_strided_slice %39 {offsets = [0, 32], sizes = [8, 32], strides = [1, 1]} : vector<8x96xf32> to vector<8x32xf32>
    %43 = arith.mulf %42, %27 : vector<8x32xf32>
    %44 = vector.extract_strided_slice %39 {offsets = [0, 0], sizes = [8, 32], strides = [1, 1]} : vector<8x96xf32> to vector<8x32xf32>
    %45 = arith.mulf %44, %41 : vector<8x32xf32>
    %46 = arith.addf %43, %45 : vector<8x32xf32>
    %47 = vector.extract_strided_slice %39 {offsets = [0, 64], sizes = [8, 32], strides = [1, 1]} : vector<8x96xf32> to vector<8x32xf32>
    %48 = math.tanh %46 : vector<8x32xf32>
    %49 = arith.mulf %47, %48 : vector<8x32xf32>
    %50 = arith.index_cast %29 : i32 to index
    %c0_21 = arith.constant 0 : index
    %51 = vector.load %arg2[%50, %c0_21] : memref<64x32xf32, #tpu.memory_space<vmem>>, vector<8x32xf32>
    %52 = arith.subf %49, %27 : vector<8x32xf32>
    %53 = arith.mulf %51, %52 : vector<8x32xf32>
    %54 = arith.addf %27, %53 : vector<8x32xf32>
    %c1_i32 = arith.constant 1 : i32
    %c8_i32_22 = arith.constant 8 : i32
    %55 = arith.muli %c1_i32, %c8_i32_22 : i32
    %56 = tpu.assume_multiple %55, 8 : i32
    %57 = arith.index_cast %56 : i32 to index
    %c0_23 = arith.constant 0 : index
    %58 = vector.load %arg11[%57, %c0_23] : memref<64x128xf32, #tpu.memory_space<vmem>>, vector<8x128xf32>
    %cst_24 = arith.constant dense<0.000000e+00> : vector<8x128xf32>
    %59 = tpu.matmul %49, %26, %cst_24 {dimension_numbers = #tpu.dot_dimension_numbers<[1], [0], [0], [1], [0, 0, 1, 1], [], []>} : vector<8x32xf32>, vector<32x128xf32>, vector<8x128xf32> -> vector<8x128xf32>
    %60 = arith.addf %58, %59 : vector<8x128xf32>
    %61 = vector.extract_strided_slice %60 {offsets = [0, 0], sizes = [8, 96], strides = [1, 1]} : vector<8x128xf32> to vector<8x96xf32>
    %62 = arith.negf %61 : vector<8x96xf32>
    %63 = math.exp %62 : vector<8x96xf32>
    %cst_25 = arith.constant 1.000000e+00 : f32
    %64 = vector.broadcast %cst_25 : f32 to vector<8x96xf32>
    %65 = arith.addf %64, %63 : vector<8x96xf32>
    %66 = arith.divf %64, %65 : vector<8x96xf32>
    %67 = vector.extract_strided_slice %60 {offsets = [0, 96], sizes = [8, 32], strides = [1, 1]} : vector<8x128xf32> to vector<8x32xf32>
    %68 = math.tanh %67 : vector<8x32xf32>
    %69 = vector.extract_strided_slice %66 {offsets = [0, 32], sizes = [8, 32], strides = [1, 1]} : vector<8x96xf32> to vector<8x32xf32>
    %70 = arith.mulf %69, %46 : vector<8x32xf32>
    %71 = vector.extract_strided_slice %66 {offsets = [0, 0], sizes = [8, 32], strides = [1, 1]} : vector<8x96xf32> to vector<8x32xf32>
    %72 = arith.mulf %71, %68 : vector<8x32xf32>
    %73 = arith.addf %70, %72 : vector<8x32xf32>
    %74 = vector.extract_strided_slice %66 {offsets = [0, 64], sizes = [8, 32], strides = [1, 1]} : vector<8x96xf32> to vector<8x32xf32>
    %75 = math.tanh %73 : vector<8x32xf32>
    %76 = arith.mulf %74, %75 : vector<8x32xf32>
    %77 = arith.index_cast %56 : i32 to index
    %c0_26 = arith.constant 0 : index
    %78 = vector.load %arg2[%77, %c0_26] : memref<64x32xf32, #tpu.memory_space<vmem>>, vector<8x32xf32>
    %79 = arith.subf %76, %54 : vector<8x32xf32>
    %80 = arith.mulf %78, %79 : vector<8x32xf32>
    %81 = arith.addf %54, %80 : vector<8x32xf32>
    %c2_i32 = arith.constant 2 : i32
    %c8_i32_27 = arith.constant 8 : i32
    %82 = arith.muli %c2_i32, %c8_i32_27 : i32
    %83 = tpu.assume_multiple %82, 8 : i32
    %84 = arith.index_cast %83 : i32 to index
    %c0_28 = arith.constant 0 : index
    %85 = vector.load %arg11[%84, %c0_28] : memref<64x128xf32, #tpu.memory_space<vmem>>, vector<8x128xf32>
    %cst_29 = arith.constant dense<0.000000e+00> : vector<8x128xf32>
    %86 = tpu.matmul %76, %26, %cst_29 {dimension_numbers = #tpu.dot_dimension_numbers<[1], [0], [0], [1], [0, 0, 1, 1], [], []>} : vector<8x32xf32>, vector<32x128xf32>, vector<8x128xf32> -> vector<8x128xf32>
    %87 = arith.addf %85, %86 : vector<8x128xf32>
    %88 = vector.extract_strided_slice %87 {offsets = [0, 0], sizes = [8, 96], strides = [1, 1]} : vector<8x128xf32> to vector<8x96xf32>
    %89 = arith.negf %88 : vector<8x96xf32>
    %90 = math.exp %89 : vector<8x96xf32>
    %cst_30 = arith.constant 1.000000e+00 : f32
    %91 = vector.broadcast %cst_30 : f32 to vector<8x96xf32>
    %92 = arith.addf %91, %90 : vector<8x96xf32>
    %93 = arith.divf %91, %92 : vector<8x96xf32>
    %94 = vector.extract_strided_slice %87 {offsets = [0, 96], sizes = [8, 32], strides = [1, 1]} : vector<8x128xf32> to vector<8x32xf32>
    %95 = math.tanh %94 : vector<8x32xf32>
    %96 = vector.extract_strided_slice %93 {offsets = [0, 32], sizes = [8, 32], strides = [1, 1]} : vector<8x96xf32> to vector<8x32xf32>
    %97 = arith.mulf %96, %73 : vector<8x32xf32>
    %98 = vector.extract_strided_slice %93 {offsets = [0, 0], sizes = [8, 32], strides = [1, 1]} : vector<8x96xf32> to vector<8x32xf32>
    %99 = arith.mulf %98, %95 : vector<8x32xf32>
    %100 = arith.addf %97, %99 : vector<8x32xf32>
    %101 = vector.extract_strided_slice %93 {offsets = [0, 64], sizes = [8, 32], strides = [1, 1]} : vector<8x96xf32> to vector<8x32xf32>
    %102 = math.tanh %100 : vector<8x32xf32>
    %103 = arith.mulf %101, %102 : vector<8x32xf32>
    %104 = arith.index_cast %83 : i32 to index
    %c0_31 = arith.constant 0 : index
    %105 = vector.load %arg2[%104, %c0_31] : memref<64x32xf32, #tpu.memory_space<vmem>>, vector<8x32xf32>
    %106 = arith.subf %103, %81 : vector<8x32xf32>
    %107 = arith.mulf %105, %106 : vector<8x32xf32>
    %108 = arith.addf %81, %107 : vector<8x32xf32>
    %c3_i32 = arith.constant 3 : i32
    %c8_i32_32 = arith.constant 8 : i32
    %109 = arith.muli %c3_i32, %c8_i32_32 : i32
    %110 = tpu.assume_multiple %109, 8 : i32
    %111 = arith.index_cast %110 : i32 to index
    %c0_33 = arith.constant 0 : index
    %112 = vector.load %arg11[%111, %c0_33] : memref<64x128xf32, #tpu.memory_space<vmem>>, vector<8x128xf32>
    %cst_34 = arith.constant dense<0.000000e+00> : vector<8x128xf32>
    %113 = tpu.matmul %103, %26, %cst_34 {dimension_numbers = #tpu.dot_dimension_numbers<[1], [0], [0], [1], [0, 0, 1, 1], [], []>} : vector<8x32xf32>, vector<32x128xf32>, vector<8x128xf32> -> vector<8x128xf32>
    %114 = arith.addf %112, %113 : vector<8x128xf32>
    %115 = vector.extract_strided_slice %114 {offsets = [0, 0], sizes = [8, 96], strides = [1, 1]} : vector<8x128xf32> to vector<8x96xf32>
    %116 = arith.negf %115 : vector<8x96xf32>
    %117 = math.exp %116 : vector<8x96xf32>
    %cst_35 = arith.constant 1.000000e+00 : f32
    %118 = vector.broadcast %cst_35 : f32 to vector<8x96xf32>
    %119 = arith.addf %118, %117 : vector<8x96xf32>
    %120 = arith.divf %118, %119 : vector<8x96xf32>
    %121 = vector.extract_strided_slice %114 {offsets = [0, 96], sizes = [8, 32], strides = [1, 1]} : vector<8x128xf32> to vector<8x32xf32>
    %122 = math.tanh %121 : vector<8x32xf32>
    %123 = vector.extract_strided_slice %120 {offsets = [0, 32], sizes = [8, 32], strides = [1, 1]} : vector<8x96xf32> to vector<8x32xf32>
    %124 = arith.mulf %123, %100 : vector<8x32xf32>
    %125 = vector.extract_strided_slice %120 {offsets = [0, 0], sizes = [8, 32], strides = [1, 1]} : vector<8x96xf32> to vector<8x32xf32>
    %126 = arith.mulf %125, %122 : vector<8x32xf32>
    %127 = arith.addf %124, %126 : vector<8x32xf32>
    %128 = vector.extract_strided_slice %120 {offsets = [0, 64], sizes = [8, 32], strides = [1, 1]} : vector<8x96xf32> to vector<8x32xf32>
    %129 = math.tanh %127 : vector<8x32xf32>
    %130 = arith.mulf %128, %129 : vector<8x32xf32>
    %131 = arith.index_cast %110 : i32 to index
    %c0_36 = arith.constant 0 : index
    %132 = vector.load %arg2[%131, %c0_36] : memref<64x32xf32, #tpu.memory_space<vmem>>, vector<8x32xf32>
    %133 = arith.subf %130, %108 : vector<8x32xf32>
    %134 = arith.mulf %132, %133 : vector<8x32xf32>
    %135 = arith.addf %108, %134 : vector<8x32xf32>
    %c4_i32 = arith.constant 4 : i32
    %c8_i32_37 = arith.constant 8 : i32
    %136 = arith.muli %c4_i32, %c8_i32_37 : i32
    %137 = tpu.assume_multiple %136, 8 : i32
    %138 = arith.index_cast %137 : i32 to index
    %c0_38 = arith.constant 0 : index
    %139 = vector.load %arg11[%138, %c0_38] : memref<64x128xf32, #tpu.memory_space<vmem>>, vector<8x128xf32>
    %cst_39 = arith.constant dense<0.000000e+00> : vector<8x128xf32>
    %140 = tpu.matmul %130, %26, %cst_39 {dimension_numbers = #tpu.dot_dimension_numbers<[1], [0], [0], [1], [0, 0, 1, 1], [], []>} : vector<8x32xf32>, vector<32x128xf32>, vector<8x128xf32> -> vector<8x128xf32>
    %141 = arith.addf %139, %140 : vector<8x128xf32>
    %142 = vector.extract_strided_slice %141 {offsets = [0, 0], sizes = [8, 96], strides = [1, 1]} : vector<8x128xf32> to vector<8x96xf32>
    %143 = arith.negf %142 : vector<8x96xf32>
    %144 = math.exp %143 : vector<8x96xf32>
    %cst_40 = arith.constant 1.000000e+00 : f32
    %145 = vector.broadcast %cst_40 : f32 to vector<8x96xf32>
    %146 = arith.addf %145, %144 : vector<8x96xf32>
    %147 = arith.divf %145, %146 : vector<8x96xf32>
    %148 = vector.extract_strided_slice %141 {offsets = [0, 96], sizes = [8, 32], strides = [1, 1]} : vector<8x128xf32> to vector<8x32xf32>
    %149 = math.tanh %148 : vector<8x32xf32>
    %150 = vector.extract_strided_slice %147 {offsets = [0, 32], sizes = [8, 32], strides = [1, 1]} : vector<8x96xf32> to vector<8x32xf32>
    %151 = arith.mulf %150, %127 : vector<8x32xf32>
    %152 = vector.extract_strided_slice %147 {offsets = [0, 0], sizes = [8, 32], strides = [1, 1]} : vector<8x96xf32> to vector<8x32xf32>
    %153 = arith.mulf %152, %149 : vector<8x32xf32>
    %154 = arith.addf %151, %153 : vector<8x32xf32>
    %155 = vector.extract_strided_slice %147 {offsets = [0, 64], sizes = [8, 32], strides = [1, 1]} : vector<8x96xf32> to vector<8x32xf32>
    %156 = math.tanh %154 : vector<8x32xf32>
    %157 = arith.mulf %155, %156 : vector<8x32xf32>
    %158 = arith.index_cast %137 : i32 to index
    %c0_41 = arith.constant 0 : index
    %159 = vector.load %arg2[%158, %c0_41] : memref<64x32xf32, #tpu.memory_space<vmem>>, vector<8x32xf32>
    %160 = arith.subf %157, %135 : vector<8x32xf32>
    %161 = arith.mulf %159, %160 : vector<8x32xf32>
    %162 = arith.addf %135, %161 : vector<8x32xf32>
    %c5_i32 = arith.constant 5 : i32
    %c8_i32_42 = arith.constant 8 : i32
    %163 = arith.muli %c5_i32, %c8_i32_42 : i32
    %164 = tpu.assume_multiple %163, 8 : i32
    %165 = arith.index_cast %164 : i32 to index
    %c0_43 = arith.constant 0 : index
    %166 = vector.load %arg11[%165, %c0_43] : memref<64x128xf32, #tpu.memory_space<vmem>>, vector<8x128xf32>
    %cst_44 = arith.constant dense<0.000000e+00> : vector<8x128xf32>
    %167 = tpu.matmul %157, %26, %cst_44 {dimension_numbers = #tpu.dot_dimension_numbers<[1], [0], [0], [1], [0, 0, 1, 1], [], []>} : vector<8x32xf32>, vector<32x128xf32>, vector<8x128xf32> -> vector<8x128xf32>
    %168 = arith.addf %166, %167 : vector<8x128xf32>
    %169 = vector.extract_strided_slice %168 {offsets = [0, 0], sizes = [8, 96], strides = [1, 1]} : vector<8x128xf32> to vector<8x96xf32>
    %170 = arith.negf %169 : vector<8x96xf32>
    %171 = math.exp %170 : vector<8x96xf32>
    %cst_45 = arith.constant 1.000000e+00 : f32
    %172 = vector.broadcast %cst_45 : f32 to vector<8x96xf32>
    %173 = arith.addf %172, %171 : vector<8x96xf32>
    %174 = arith.divf %172, %173 : vector<8x96xf32>
    %175 = vector.extract_strided_slice %168 {offsets = [0, 96], sizes = [8, 32], strides = [1, 1]} : vector<8x128xf32> to vector<8x32xf32>
    %176 = math.tanh %175 : vector<8x32xf32>
    %177 = vector.extract_strided_slice %174 {offsets = [0, 32], sizes = [8, 32], strides = [1, 1]} : vector<8x96xf32> to vector<8x32xf32>
    %178 = arith.mulf %177, %154 : vector<8x32xf32>
    %179 = vector.extract_strided_slice %174 {offsets = [0, 0], sizes = [8, 32], strides = [1, 1]} : vector<8x96xf32> to vector<8x32xf32>
    %180 = arith.mulf %179, %176 : vector<8x32xf32>
    %181 = arith.addf %178, %180 : vector<8x32xf32>
    %182 = vector.extract_strided_slice %174 {offsets = [0, 64], sizes = [8, 32], strides = [1, 1]} : vector<8x96xf32> to vector<8x32xf32>
    %183 = math.tanh %181 : vector<8x32xf32>
    %184 = arith.mulf %182, %183 : vector<8x32xf32>
    %185 = arith.index_cast %164 : i32 to index
    %c0_46 = arith.constant 0 : index
    %186 = vector.load %arg2[%185, %c0_46] : memref<64x32xf32, #tpu.memory_space<vmem>>, vector<8x32xf32>
    %187 = arith.subf %184, %162 : vector<8x32xf32>
    %188 = arith.mulf %186, %187 : vector<8x32xf32>
    %189 = arith.addf %162, %188 : vector<8x32xf32>
    %c6_i32 = arith.constant 6 : i32
    %c8_i32_47 = arith.constant 8 : i32
    %190 = arith.muli %c6_i32, %c8_i32_47 : i32
    %191 = tpu.assume_multiple %190, 8 : i32
    %192 = arith.index_cast %191 : i32 to index
    %c0_48 = arith.constant 0 : index
    %193 = vector.load %arg11[%192, %c0_48] : memref<64x128xf32, #tpu.memory_space<vmem>>, vector<8x128xf32>
    %cst_49 = arith.constant dense<0.000000e+00> : vector<8x128xf32>
    %194 = tpu.matmul %184, %26, %cst_49 {dimension_numbers = #tpu.dot_dimension_numbers<[1], [0], [0], [1], [0, 0, 1, 1], [], []>} : vector<8x32xf32>, vector<32x128xf32>, vector<8x128xf32> -> vector<8x128xf32>
    %195 = arith.addf %193, %194 : vector<8x128xf32>
    %196 = vector.extract_strided_slice %195 {offsets = [0, 0], sizes = [8, 96], strides = [1, 1]} : vector<8x128xf32> to vector<8x96xf32>
    %197 = arith.negf %196 : vector<8x96xf32>
    %198 = math.exp %197 : vector<8x96xf32>
    %cst_50 = arith.constant 1.000000e+00 : f32
    %199 = vector.broadcast %cst_50 : f32 to vector<8x96xf32>
    %200 = arith.addf %199, %198 : vector<8x96xf32>
    %201 = arith.divf %199, %200 : vector<8x96xf32>
    %202 = vector.extract_strided_slice %195 {offsets = [0, 96], sizes = [8, 32], strides = [1, 1]} : vector<8x128xf32> to vector<8x32xf32>
    %203 = math.tanh %202 : vector<8x32xf32>
    %204 = vector.extract_strided_slice %201 {offsets = [0, 32], sizes = [8, 32], strides = [1, 1]} : vector<8x96xf32> to vector<8x32xf32>
    %205 = arith.mulf %204, %181 : vector<8x32xf32>
    %206 = vector.extract_strided_slice %201 {offsets = [0, 0], sizes = [8, 32], strides = [1, 1]} : vector<8x96xf32> to vector<8x32xf32>
    %207 = arith.mulf %206, %203 : vector<8x32xf32>
    %208 = arith.addf %205, %207 : vector<8x32xf32>
    %209 = vector.extract_strided_slice %201 {offsets = [0, 64], sizes = [8, 32], strides = [1, 1]} : vector<8x96xf32> to vector<8x32xf32>
    %210 = math.tanh %208 : vector<8x32xf32>
    %211 = arith.mulf %209, %210 : vector<8x32xf32>
    %212 = arith.index_cast %191 : i32 to index
    %c0_51 = arith.constant 0 : index
    %213 = vector.load %arg2[%212, %c0_51] : memref<64x32xf32, #tpu.memory_space<vmem>>, vector<8x32xf32>
    %214 = arith.subf %211, %189 : vector<8x32xf32>
    %215 = arith.mulf %213, %214 : vector<8x32xf32>
    %216 = arith.addf %189, %215 : vector<8x32xf32>
    %c7_i32 = arith.constant 7 : i32
    %c8_i32_52 = arith.constant 8 : i32
    %217 = arith.muli %c7_i32, %c8_i32_52 : i32
    %218 = tpu.assume_multiple %217, 8 : i32
    %219 = arith.index_cast %218 : i32 to index
    %c0_53 = arith.constant 0 : index
    %220 = vector.load %arg11[%219, %c0_53] : memref<64x128xf32, #tpu.memory_space<vmem>>, vector<8x128xf32>
    %cst_54 = arith.constant dense<0.000000e+00> : vector<8x128xf32>
    %221 = tpu.matmul %211, %26, %cst_54 {dimension_numbers = #tpu.dot_dimension_numbers<[1], [0], [0], [1], [0, 0, 1, 1], [], []>} : vector<8x32xf32>, vector<32x128xf32>, vector<8x128xf32> -> vector<8x128xf32>
    %222 = arith.addf %220, %221 : vector<8x128xf32>
    %223 = vector.extract_strided_slice %222 {offsets = [0, 0], sizes = [8, 96], strides = [1, 1]} : vector<8x128xf32> to vector<8x96xf32>
    %224 = arith.negf %223 : vector<8x96xf32>
    %225 = math.exp %224 : vector<8x96xf32>
    %cst_55 = arith.constant 1.000000e+00 : f32
    %226 = vector.broadcast %cst_55 : f32 to vector<8x96xf32>
    %227 = arith.addf %226, %225 : vector<8x96xf32>
    %228 = arith.divf %226, %227 : vector<8x96xf32>
    %229 = vector.extract_strided_slice %222 {offsets = [0, 96], sizes = [8, 32], strides = [1, 1]} : vector<8x128xf32> to vector<8x32xf32>
    %230 = math.tanh %229 : vector<8x32xf32>
    %231 = vector.extract_strided_slice %228 {offsets = [0, 32], sizes = [8, 32], strides = [1, 1]} : vector<8x96xf32> to vector<8x32xf32>
    %232 = arith.mulf %231, %208 : vector<8x32xf32>
    %233 = vector.extract_strided_slice %228 {offsets = [0, 0], sizes = [8, 32], strides = [1, 1]} : vector<8x96xf32> to vector<8x32xf32>
    %234 = arith.mulf %233, %230 : vector<8x32xf32>
    %235 = arith.addf %232, %234 : vector<8x32xf32>
    %236 = vector.extract_strided_slice %228 {offsets = [0, 64], sizes = [8, 32], strides = [1, 1]} : vector<8x96xf32> to vector<8x32xf32>
    %237 = math.tanh %235 : vector<8x32xf32>
    %238 = arith.mulf %236, %237 : vector<8x32xf32>
    %239 = arith.index_cast %218 : i32 to index
    %c0_56 = arith.constant 0 : index
    %240 = vector.load %arg2[%239, %c0_56] : memref<64x32xf32, #tpu.memory_space<vmem>>, vector<8x32xf32>
    %241 = arith.subf %238, %216 : vector<8x32xf32>
    %242 = arith.mulf %240, %241 : vector<8x32xf32>
    %243 = arith.addf %216, %242 : vector<8x32xf32>
    %c8_i32_57 = arith.constant 8 : i32
    %c0_58 = arith.constant 0 : index
    %c0_59 = arith.constant 0 : index
    %244 = vector.load %arg8[%c0_58, %c0_59] : memref<64x128xf32, #tpu.memory_space<vmem>>, vector<64x128xf32>
    %245 = vector.extract_strided_slice %244 {offsets = [0, 0], sizes = [32, 128], strides = [1, 1]} : vector<64x128xf32> to vector<32x128xf32>
    %cst_60 = arith.constant dense<0.000000e+00> : vector<8x128xf32>
    %246 = tpu.matmul %243, %245, %cst_60 {dimension_numbers = #tpu.dot_dimension_numbers<[1], [0], [0], [1], [0, 0, 1, 1], [], []>} : vector<8x32xf32>, vector<32x128xf32>, vector<8x128xf32> -> vector<8x128xf32>
    %247 = vector.extract_strided_slice %244 {offsets = [32, 0], sizes = [32, 128], strides = [1, 1]} : vector<64x128xf32> to vector<32x128xf32>
    %cst_61 = arith.constant dense<0.000000e+00> : vector<8x128xf32>
    %248 = tpu.matmul %25, %247, %cst_61 {dimension_numbers = #tpu.dot_dimension_numbers<[1], [0], [0], [1], [0, 0, 1, 1], [], []>} : vector<8x32xf32>, vector<32x128xf32>, vector<8x128xf32> -> vector<8x128xf32>
    %249 = arith.addf %246, %248 : vector<8x128xf32>
    %c0_62 = arith.constant 0 : index
    %c0_63 = arith.constant 0 : index
    %250 = vector.load %arg9[%c0_62, %c0_63] : memref<1x128xf32, #tpu.memory_space<vmem>>, vector<1x128xf32>
    %251 = vector.broadcast %250 : vector<1x128xf32> to vector<8x128xf32>
    %252 = arith.addf %249, %251 : vector<8x128xf32>
    %c0_64 = arith.constant 0 : index
    %c0_65 = arith.constant 0 : index
    %253 = vector.load %arg10[%c0_64, %c0_65] : memref<8x128xf32, #tpu.memory_space<vmem>>, vector<8x128xf32>
    tpu.vector_store %arg10[%c0_64, %c0_65], %252 {strides = array<i32>} : memref<8x128xf32, #tpu.memory_space<vmem>>, vector<8x128xf32>,
    return
  }
}

</mosaic_0001>

<bundles_post_ra>
// kernel: rnn_forward.1
= control target key start
LH: loop header
LB: loop body
LE: loop exit
PB: predicated region body
PF: predicated region fallthrough
CT: control target
= control target key end

     0   :  { %v1772_v0 = vmov 0.0|0.0   ;;  %vm1773_vm0 = vmmov 0   ;;  %v1774_v4 = vmov 0.0   ;;  %vm54_vm1 = vcmask 261120   ;;  %s1775_s21 = smov 32   ;;  %s1776_s12 = smov 64   ;;  %s2138_s6 = inlined_call_operand.vmem [shape: f32[32,128], index: 6, kind: input, shape index: {}]   ;;  %s2139_s3 = inlined_call_operand.vmem [shape: f32[32,128], index: 3, kind: input, shape index: {}]   ;;  %s2140_s0 = inlined_call_operand.vmem [shape: f32[64,32], index: 0, kind: input, shape index: {}]   ;;  %s2141_s4 = inlined_call_operand.vmem [shape: f32[32,128], index: 4, kind: input, shape index: {}]   ;;  %s2142_s1 = inlined_call_operand.vmem [shape: f32[8,32], index: 1, kind: input, shape index: {}]   ;;  %s2143_s5 = inlined_call_operand.vmem [shape: f32[1,128], index: 5, kind: input, shape index: {}]   ;;  %s2144_s2 = inlined_call_operand.vmem [shape: f32[64,32], index: 2, kind: input, shape index: {}]   ;;  %s2145_s7 = inlined_call_operand.vmem [shape: f32[1,128], index: 7, kind: input, shape index: {}]   ;;  %s2146_s8 = inlined_call_operand.vmem [shape: f32[64,128], index: 8, kind: input, shape index: {}]   ;;  %s2147_s9 = inlined_call_operand.vmem [shape: f32[1,128], index: 9, kind: input, shape index: {}]   ;;  %s2148_s10 = inlined_call_operand.vmem [shape: f32[8,128], index: 10, kind: output, shape index: {}]  }
   0x1   :  { %1629 = vmatprep.subr.bf16.mxu1 %v1772_v0  ;;  %v193_v1 = vld [vmem:[%s2138_s6] sm:$0xff]  ;;  %v194_v2 = vld [vmem:[%s2138_s6 + $0x8] sm:$0xff]  ;;  %1508 = vmatprep.mubr.msk.f32.mxu1 %vm1773_vm0, %v1774_v4  ;;  %v195_v7 = vld [vmem:[%s2138_s6 + $0x10] sm:$0xff] }
   0x2   :  { %v43_v3 = vld [vmem:[%s2139_s3] sm:$0xff]  ;;  %v1630_v5 = vpack.c.bf16 %v194_v2, %v193_v1  ;;  %v44_v6 = vld [vmem:[%s2139_s3 + $0x8] sm:$0xff]  ;;  %v196_v8 = vld [vmem:[%s2138_s6 + $0x18] sm:$0xff] }
   0x3   :  { %v1621_v9 = vpack.c.bf16 %v44_v6, %v43_v3  ;;  %v45_v10 = vld [vmem:[%s2139_s3 + $0x10] sm:$0xff]  ;;  %v46_v11 = vld [vmem:[%s2139_s3 + $0x18] sm:$0xff]  ;;  %v1633_v12 = vpack.c.bf16 %v196_v8, %v195_v7  ;;  %v35_v14 = vld [vmem:[%s2140_s0] sm:$0xff] }
   0x4   :  { %1631 = vmatpush3.bf16.msra.mxu1 %v1630_v5  ;;  %v1625_v13 = vpack.c.bf16 %v46_v11, %v45_v10  ;;  %v295_v15 = vld [vmem:[%s2141_s4] sm:$0xff]  ;;  %v296_v16 = vld [vmem:[%s2141_s4 + $0x8] sm:$0xff]  ;;  %1488 = vmatprep.mubr.msk.f32.mxu0 %vm54_vm1, %v35_v14  ;;  %v297_v19 = vld [vmem:[%s2141_s4 + $0x10] sm:$0xff] }
   0x5   :  { %1622 = vmatprep.subr.bf16.mxu0 %v1621_v9  ;;  %1632 = vmatprep.subr.bf16.mxu1 %v1772_v0  ;;  %v192_v17 = vld [vmem:[%s2142_s1] sm:$0xff]  ;;  %v1873_v18 = vpack.c.bf16 %v296_v16, %v295_v15  ;;  %v298_v20 = vld [vmem:[%s2141_s4 + $0x18] sm:$0xff]  ;;  %v36_v21 = vld [vmem:[%s2140_s0 + $0x8] sm:$0xff] }
   0x6   :  { %1624 = vmatpush3.bf16.msra.mxu0 %v1621_v9  ;;  %v1888_v22 = vpack.c.bf16 %v298_v20, %v297_v19  ;;  %v1912_v26 = vld [vmem:[%s2143_s5] ss:$0 sm:$0xff]  ;;  %v37_v42 = vld [vmem:[%s2140_s0 + $0x10] sm:$0xff]  ;;  %v38_v43 = vld [vmem:[%s2140_s0 + $0x18] sm:$0xff] }
   0x7   :  { %1626 = vmatprep.subr.bf16.mxu0 %v1625_v13  ;;  %v39_v44 = vld [vmem:[%s2140_s0 + $0x20] sm:$0xff]  ;;  %v40_v45 = vld [vmem:[%s2140_s0 + $0x28] sm:$0xff]  ;;  %v41_v46 = vld [vmem:[%s2140_s0 + $0x30] sm:$0xff] }
   0x8   :  { %1634 = vmatpush3.bf16.msra.mxu1 %v1633_v12  ;;  %v42_v47 = vld [vmem:[%s2140_s0 + $0x38] sm:$0xff] }
   0x9   :  { %1635 = vmatprep.subr.bf16.mxu1 %v1772_v0 }
   0xa   :  { %1628 = vmatpush3.bf16.msra.mxu0 %v1625_v13 }
   0xb   :  { %1509 = vmatmul.mubr.msk.f32.vlgmr.msra.gmra.mrb[0].mxu1 %vm54_vm1, %v192_v17  ;;  %1641 = vmatprep.subr.bf16.mxu0 %v1772_v0 }
   0xc   :  { %1637 = vmatpush3.bf16.msra.mxu1 %v1873_v18  ;;  %1519 = vmatprep.mubr.msk.f32.mxu1 %vm1773_vm0, %v1774_v4 }
   0xd   :  { %1489 = vmatmul.mubr.msk.f32.vlgmr.msra.gmra.mrb[0].mxu0 %vm54_vm1, %v36_v21  ;;  %1638 = vmatprep.subr.bf16.mxu1 %v1772_v0 }
   0xe   :  { %1643 = vmatpush3.bf16.msra.mxu0 %v1873_v18  ;;  %1491 = vmatprep.mubr.msk.f32.mxu0 %vm54_vm1, %v37_v42 }
   0xf   :  { %1644 = vmatprep.subr.bf16.mxu0 %v1772_v0 }
  0x10   :  { %1640 = vmatpush3.bf16.msra.mxu1 %v1888_v22 }
  0x11   :  { %1647 = vmatprep.subr.bf16.mxu1 %v1772_v0  ;;  %1492 = vmatmul.mubr.msk.f32.gmra.mrb[2].mxu0 %vm54_vm1, %v38_v43 }
  0x12   :  { %1646 = vmatpush3.bf16.msra.mxu0 %v1888_v22  ;;  %1494 = vmatprep.mubr.msk.f32.mxu0 %vm54_vm1, %v39_v44 }
  0x13   :  { %1520 = vmatmul.mubr.f32.vlgmr.msra.gmra.mrb[2].mxu1 %v1774_v4  ;;  %1653 = vmatprep.subr.bf16.mxu0 %v1772_v0 }
  0x14   :  { %1649 = vmatpush3.bf16.msra.mxu1 %v1873_v18  ;;  %1541 = vmatprep.mubr.msk.f32.mxu1 %vm1773_vm0, %v1774_v4 }
  0x15   :  { %1650 = vmatprep.subr.bf16.mxu1 %v1772_v0  ;;  %1495 = vmatmul.mubr.msk.f32.gmra.mrb[4].mxu0 %vm54_vm1, %v40_v45 }
  0x16   :  { %1497 = vmatprep.mubr.msk.f32.mxu0 %vm54_vm1, %v41_v46 }
  0x18   :  { %1652 = vmatpush3.bf16.msra.mxu1 %v1888_v22 }
  0x19   :  { %1659 = vmatprep.subr.bf16.mxu1 %v1772_v0  ;;  %1498 = vmatmul.mubr.msk.f32.gmra.mrb[6].mxu0 %vm54_vm1, %v42_v47 }
  0x1a   :  { %1530 = vmatprep.mubr.msk.f32.mxu0 %vm1773_vm0, %v1774_v4 }
  0xde   :  { %v1907_v23 = vpop.f32.mrb[0].mxu1 }
  0xdf   :  { %v1510_v24 = vpop.f32.mrb[1].mxu1 }
  0xe0   :  { %v1490_v25 = vpop.f32.mrb[0].mxu0 }
  0xe1   :  { %v145_v27 = vpop.f32.mrb[1].mxu0  ;;  %v151_v58 = vadd.f32 %v1490_v25, %v1912_v26 }
  0xe2   :  { %v146_v28 = vadd.f32 %v1912_v26, %v145_v27 }
  0xe4   :  { %v1945_v51 = vpop.f32.mrb[2].mxu0 }
  0xe5   :  { %v155_v52 = vpop.f32.mrb[3].mxu0 }
  0xe6   :  { %v369_v29 = vpop.f32.mrb[2].mxu1  ;;  %v156_v14 = vadd.f32 %v1912_v26, %v155_v52 }
  0xe7   :  { %v373_v30 = vadd.f32 %v369_v29, %v146_v28  ;;  %v1521_v31 = vpop.f32.mrb[3].mxu1 }
  0xe8   :  { %v1947_v53 = vpop.f32.mrb[4].mxu0 }
  0xe9   :  { %1700 = vtanh.f32 %v373_v30  ;;  %v1388_v33 = vmul.f32 -1.442695, %v373_v30  ;;  %v1949_v54 = vpop.f32.mrb[5].mxu0 }
  0xeb   :  { %1702 = vpow2.f32 %v1388_v33 }
  0xec   :  { %v1951_v55 = vpop.f32.mrb[6].mxu0 }
  0xed   :  { %v1953_v56 = vpop.f32.mrb[7].mxu0 }
  0xf3   :  { %v1701_v32 = vpop.eup %1700 }
  0xf4   :  { %383 = vrot.lane.b32.xlu0 %v1701_v32, %s1775_s21 }
  0xf5   :  { %v1703_v34 = vpop.eup %1702 }
  0xf6   :  { %v377_v35 = vadd.f32 1.0, %v1703_v34 }
  0xf8   :  { %1704 = vrcp.f32 %v377_v35 }
 0x102   :  { %v1705_v36 = vpop.eup %1704 }
 0x103   :  { %v381_v39 = vmul.f32 0.0, %v1705_v36 }
 0x166   :  { %v384_v37 = vpop.permute.xlu0 %383 }
 0x167   :  { %v386_v38 = vmul.f32 %v1705_v36, %v384_v37 }
 0x169   :  { %388 = vrot.lane.b32.xlu0 %v386_v38, %s1775_s21 }
 0x1db   :  { %v389_v40 = vpop.permute.xlu0 %388 }
 0x1dc   :  { %v391_v41 = vadd.f32 %v389_v40, %v381_v39 }
 0x1de   :  { %1706 = vtanh.f32 %v391_v41 }
 0x1e8   :  { %v1707_v48 = vpop.eup %1706 }
 0x1e9   :  { %394 = vrot.lane.b32.xlu1 %v1707_v48, %s1775_s21 }
 0x25b   :  { %v395_v49 = vpop.permute.xlu1 %394 }
 0x25c   :  { %v397_v50 = vmul.f32 %v1705_v36, %v395_v49  ;;  %v161_v36 = vadd.f32 %v1945_v51, %v1912_v26 }
 0x25e   :  { %400 = vrot.lane.b32.xlu1 %v397_v50, %s1776_s12 }
 0x2d0   :  { %v1955_v57 = vpop.permute.xlu1 %400 }
 0x2d1   :  { %1531 = vmatmul.mubr.msk.f32.vlgmr.msra.gmra.mrb[8].mxu0 %vm54_vm1, %v1955_v57 }
 0x2d2   :  { %1655 = vmatpush3.bf16.msra.mxu0 %v1873_v18  ;;  %1552 = vmatprep.mubr.msk.f32.mxu0 %vm1773_vm0, %v1774_v4 }
 0x2d3   :  { %1656 = vmatprep.subr.bf16.mxu0 %v1772_v0 }
 0x2d6   :  { %1658 = vmatpush3.bf16.msra.mxu0 %v1888_v22 }
 0x2d7   :  { %1665 = vmatprep.subr.bf16.mxu0 %v1772_v0 }
 0x3a4   :  { %v475_v59 = vpop.f32.mrb[8].mxu0 }
 0x3a5   :  { %v479_v60 = vadd.f32 %v475_v59, %v151_v58  ;;  %v1532_v61 = vpop.f32.mrb[9].mxu0  ;;  %v166_v59 = vadd.f32 %v1912_v26, %v1949_v54 }
 0x3a7   :  { %1708 = vtanh.f32 %v479_v60  ;;  %v1390_v63 = vmul.f32 -1.442695, %v479_v60 }
 0x3a9   :  { %1710 = vpow2.f32 %v1390_v63 }
 0x3b1   :  { %v1709_v62 = vpop.eup %1708 }
 0x3b2   :  { %489 = vrot.lane.b32.xlu0 %v1709_v62, %s1775_s21 }
 0x3b3   :  { %v1711_v1 = vpop.eup %1710 }
 0x3b4   :  { %v483_v2 = vadd.f32 1.0, %v1711_v1 }
 0x3b6   :  { %1712 = vrcp.f32 %v483_v2 }
 0x3c0   :  { %v1713_v3 = vpop.eup %1712 }
 0x3c1   :  { %v487_v7 = vmul.f32 %v1713_v3, %v391_v41 }
 0x424   :  { %v490_v5 = vpop.permute.xlu0 %489 }
 0x425   :  { %v492_v6 = vmul.f32 %v1713_v3, %v490_v5 }
 0x427   :  { %494 = vrot.lane.b32.xlu1 %v492_v6, %s1775_s21 }
 0x499   :  { %v495_v8 = vpop.permute.xlu1 %494 }
 0x49a   :  { %v497_v9 = vadd.f32 %v495_v8, %v487_v7 }
 0x49c   :  { %1714 = vtanh.f32 %v497_v9 }
 0x4a6   :  { %v1715_v10 = vpop.eup %1714 }
 0x4a7   :  { %500 = vrot.lane.b32.xlu0 %v1715_v10, %s1775_s21 }
 0x519   :  { %v501_v11 = vpop.permute.xlu0 %500 }
 0x51a   :  { %v1969_v12 = vmul.f32 %v1713_v3, %v501_v11 }
 0x51c   :  { %520 = vrot.lane.b32.xlu1 %v1969_v12, %s1776_s12 }
 0x58e   :  { %v521_v13 = vpop.permute.xlu1 %520 }
 0x58f   :  { %1542 = vmatmul.mubr.msk.f32.vlgmr.msra.gmra.mrb[4].mxu1 %vm54_vm1, %v521_v13 }
 0x590   :  { %1661 = vmatpush3.bf16.msra.mxu1 %v1873_v18  ;;  %1563 = vmatprep.mubr.msk.f32.mxu1 %vm1773_vm0, %v1774_v4 }
 0x591   :  { %1662 = vmatprep.subr.bf16.mxu1 %v1772_v0 }
 0x594   :  { %1664 = vmatpush3.bf16.msra.mxu1 %v1888_v22 }
 0x595   :  { %1671 = vmatprep.subr.bf16.mxu1 %v1772_v0 }
 0x662   :  { %v590_v15 = vpop.f32.mrb[4].mxu1 }
 0x663   :  { %v594_v16 = vadd.f32 %v590_v15, %v156_v14  ;;  %v1543_v17 = vpop.f32.mrb[5].mxu1  ;;  %v171_v15 = vadd.f32 %v1947_v53, %v1912_v26 }
 0x665   :  { %1716 = vtanh.f32 %v594_v16  ;;  %v1393_v20 = vmul.f32 -1.442695, %v594_v16 }
 0x667   :  { %1718 = vpow2.f32 %v1393_v20 }
 0x66f   :  { %v1717_v19 = vpop.eup %1716 }
 0x670   :  { %604 = vrot.lane.b32.xlu0 %v1717_v19, %s1775_s21 }
 0x671   :  { %v1719_v21 = vpop.eup %1718 }
 0x672   :  { %v598_v24 = vadd.f32 1.0, %v1719_v21 }
 0x674   :  { %1720 = vrcp.f32 %v598_v24 }
 0x67e   :  { %v1721_v25 = vpop.eup %1720 }
 0x67f   :  { %v602_v29 = vmul.f32 %v1721_v25, %v497_v9 }
 0x6e2   :  { %v605_v27 = vpop.permute.xlu0 %604 }
 0x6e3   :  { %v607_v28 = vmul.f32 %v1721_v25, %v605_v27 }
 0x6e5   :  { %609 = vrot.lane.b32.xlu1 %v607_v28, %s1775_s21 }
 0x757   :  { %v610_v30 = vpop.permute.xlu1 %609 }
 0x758   :  { %v612_v31 = vadd.f32 %v610_v30, %v602_v29 }
 0x75a   :  { %1722 = vtanh.f32 %v612_v31 }
 0x764   :  { %v1723_v32 = vpop.eup %1722 }
 0x765   :  { %615 = vrot.lane.b32.xlu0 %v1723_v32, %s1775_s21 }
 0x7d7   :  { %v616_v33 = vpop.permute.xlu0 %615 }
 0x7d8   :  { %v1984_v34 = vmul.f32 %v1721_v25, %v616_v33 }
 0x7da   :  { %635 = vrot.lane.b32.xlu1 %v1984_v34, %s1776_s12 }
 0x84c   :  { %v636_v35 = vpop.permute.xlu1 %635 }
 0x84d   :  { %1553 = vmatmul.mubr.msk.f32.vlgmr.msra.gmra.mrb[10].mxu0 %vm54_vm1, %v636_v35 }
 0x84e   :  { %1667 = vmatpush3.bf16.msra.mxu0 %v1873_v18  ;;  %1574 = vmatprep.mubr.msk.f32.mxu0 %vm1773_vm0, %v1774_v4 }
 0x84f   :  { %1668 = vmatprep.subr.bf16.mxu0 %v1772_v0 }
 0x852   :  { %1670 = vmatpush3.bf16.msra.mxu0 %v1888_v22 }
 0x853   :  { %1677 = vmatprep.subr.bf16.mxu0 %v1772_v0 }
 0x920   :  { %v705_v37 = vpop.f32.mrb[10].mxu0 }
 0x921   :  { %v709_v38 = vadd.f32 %v705_v37, %v161_v36  ;;  %v1554_v39 = vpop.f32.mrb[11].mxu0 }
 0x923   :  { %1724 = vtanh.f32 %v709_v38  ;;  %v1396_v41 = vmul.f32 -1.442695, %v709_v38 }
 0x925   :  { %1726 = vpow2.f32 %v1396_v41 }
 0x92d   :  { %v1725_v40 = vpop.eup %1724 }
 0x92e   :  { %719 = vrot.lane.b32.xlu0 %v1725_v40, %s1775_s21 }
 0x92f   :  { %v1727_v42 = vpop.eup %1726 }
 0x930   :  { %v713_v43 = vadd.f32 1.0, %v1727_v42 }
 0x932   :  { %1728 = vrcp.f32 %v713_v43  ;;  %v176_v43 = vadd.f32 %v1912_v26, %v1953_v56 }
 0x93c   :  { %v1729_v44 = vpop.eup %1728 }
 0x93d   :  { %v717_v47 = vmul.f32 %v1729_v44, %v612_v31  ;;  %v398_v31 = vld [vmem:[%s2144_s2] sm:$0xff] }
 0x93e   :  { %v403_v32 = vmul.f32 %v1955_v57, %v398_v31  ;;  %v1391_v57 = vld [vmem:[%s2144_s2 + $0x8] sm:$0xff] }
 0x9a0   :  { %v720_v45 = vpop.permute.xlu0 %719 }
 0x9a1   :  { %v722_v46 = vmul.f32 %v1729_v44, %v720_v45 }
 0x9a3   :  { %724 = vrot.lane.b32.xlu1 %v722_v46, %s1775_s21 }
 0xa15   :  { %v725_v48 = vpop.permute.xlu1 %724 }
 0xa16   :  { %v727_v49 = vadd.f32 %v725_v48, %v717_v47  ;;  %v1394_v48 = vld [vmem:[%s2144_s2 + $0x10] sm:$0xff] }
 0xa18   :  { %1730 = vtanh.f32 %v727_v49 }
 0xa22   :  { %v1731_v50 = vpop.eup %1730 }
 0xa23   :  { %730 = vrot.lane.b32.xlu0 %v1731_v50, %s1775_s21 }
 0xa95   :  { %v731_v51 = vpop.permute.xlu0 %730 }
 0xa96   :  { %v2000_v52 = vmul.f32 %v1729_v44, %v731_v51 }
 0xa98   :  { %750 = vrot.lane.b32.xlu1 %v2000_v52, %s1776_s12 }
 0xb0a   :  { %v751_v58 = vpop.permute.xlu1 %750 }
 0xb0b   :  { %1564 = vmatmul.mubr.msk.f32.vlgmr.msra.gmra.mrb[6].mxu1 %vm54_vm1, %v751_v58 }
 0xb0c   :  { %1673 = vmatpush3.bf16.msra.mxu1 %v1873_v18  ;;  %1585 = vmatprep.mubr.msk.f32.mxu1 %vm1773_vm0, %v1774_v4 }
 0xb0d   :  { %1674 = vmatprep.subr.bf16.mxu1 %v1772_v0 }
 0xb10   :  { %1676 = vmatpush3.bf16.msra.mxu1 %v1888_v22 }
 0xb11   :  { %1683 = vmatprep.subr.bf16.mxu1 %v1772_v0 }
 0xbde   :  { %v820_v60 = vpop.f32.mrb[6].mxu1 }
 0xbdf   :  { %v824_v61 = vadd.f32 %v820_v60, %v166_v59  ;;  %v1565_v62 = vpop.f32.mrb[7].mxu1 }
 0xbe1   :  { %1732 = vtanh.f32 %v824_v61  ;;  %v1399_v1 = vmul.f32 -1.442695, %v824_v61 }
 0xbe3   :  { %1734 = vpow2.f32 %v1399_v1 }
 0xbeb   :  { %v1733_v63 = vpop.eup %1732 }
 0xbec   :  { %834 = vrot.lane.b32.xlu0 %v1733_v63, %s1775_s21 }
 0xbed   :  { %v1735_v2 = vpop.eup %1734 }
 0xbee   :  { %v828_v3 = vadd.f32 1.0, %v1735_v2 }
 0xbf0   :  { %1736 = vrcp.f32 %v828_v3 }
 0xbfa   :  { %v1737_v5 = vpop.eup %1736 }
 0xbfb   :  { %v832_v8 = vmul.f32 %v1737_v5, %v727_v49 }
 0xc5e   :  { %v835_v6 = vpop.permute.xlu0 %834 }
 0xc5f   :  { %v837_v7 = vmul.f32 %v1737_v5, %v835_v6  ;;  %v1397_v6 = vld [vmem:[%s2144_s2 + $0x18] sm:$0xff] }
 0xc61   :  { %839 = vrot.lane.b32.xlu1 %v837_v7, %s1775_s21 }
 0xcd3   :  { %v840_v9 = vpop.permute.xlu1 %839 }
 0xcd4   :  { %v842_v54 = vadd.f32 %v840_v9, %v832_v8 }
 0xcd6   :  { %1738 = vtanh.f32 %v842_v54 }
 0xce0   :  { %v1739_v10 = vpop.eup %1738 }
 0xce1   :  { %845 = vrot.lane.b32.xlu0 %v1739_v10, %s1775_s21 }
 0xd53   :  { %v846_v11 = vpop.permute.xlu0 %845 }
 0xd54   :  { %v2016_v13 = vmul.f32 %v1737_v5, %v846_v11 }
 0xd56   :  { %865 = vrot.lane.b32.xlu1 %v2016_v13, %s1776_s12 }
 0xdc8   :  { %v866_v14 = vpop.permute.xlu1 %865 }
 0xdc9   :  { %1575 = vmatmul.mubr.msk.f32.vlgmr.msra.gmra.mrb[12].mxu0 %vm54_vm1, %v866_v14 }
 0xdca   :  { %1679 = vmatpush3.bf16.msra.mxu0 %v1873_v18  ;;  %1596 = vmatprep.mubr.msk.f32.mxu0 %vm1773_vm0, %v1774_v4 }
 0xdcb   :  { %1680 = vmatprep.subr.bf16.mxu0 %v1772_v0 }
 0xdce   :  { %1682 = vmatpush3.bf16.msra.mxu0 %v1888_v22 }
 0xdcf   :  { %1689 = vmatprep.subr.bf16.mxu0 %v1772_v0 }
 0xe9c   :  { %v935_v16 = vpop.f32.mrb[12].mxu0 }
 0xe9d   :  { %v939_v17 = vadd.f32 %v935_v16, %v171_v15  ;;  %v1576_v19 = vpop.f32.mrb[13].mxu0  ;;  %v1400_v15 = vld [vmem:[%s2144_s2 + $0x20] sm:$0xff] }
 0xe9f   :  { %1740 = vtanh.f32 %v939_v17  ;;  %v1402_v18 = vmul.f32 -1.442695, %v939_v17 }
 0xea1   :  { %1742 = vpow2.f32 %v1402_v18  ;;  %v181_v18 = vadd.f32 %v1951_v55, %v1912_v26 }
 0xea9   :  { %v1741_v20 = vpop.eup %1740 }
 0xeaa   :  { %949 = vrot.lane.b32.xlu0 %v1741_v20, %s1775_s21 }
 0xeab   :  { %v1743_v21 = vpop.eup %1742 }
 0xeac   :  { %v943_v24 = vadd.f32 1.0, %v1743_v21 }
 0xeae   :  { %1744 = vrcp.f32 %v943_v24 }
 0xeb8   :  { %v1745_v25 = vpop.eup %1744 }
 0xeb9   :  { %v947_v28 = vmul.f32 %v1745_v25, %v842_v54 }
 0xf1c   :  { %v950_v27 = vpop.permute.xlu0 %949 }
 0xf1d   :  { %v952_v22 = vmul.f32 %v1745_v25, %v950_v27  ;;  %v1385_v27 = vld [vmem:[%s2145_s7] ss:$0 sm:$0xff] }
 0xf1f   :  { %954 = vrot.lane.b32.xlu1 %v952_v22, %s1775_s21  ;;  %v274_v22 = vadd.f32 %v1385_v27, %v1907_v23 }
 0xf91   :  { %v955_v29 = vpop.permute.xlu1 %954 }
 0xf92   :  { %v957_v53 = vadd.f32 %v955_v29, %v947_v28  ;;  %v1403_v28 = vld [vmem:[%s2144_s2 + $0x28] sm:$0xff] }
 0xf94   :  { %1746 = vtanh.f32 %v957_v53 }
 0xf9e   :  { %v1747_v30 = vpop.eup %1746 }
 0xf9f   :  { %960 = vrot.lane.b32.xlu0 %v1747_v30, %s1775_s21 }
 0xfa3   :  { %507 = vrot.lane.b32.xlu0 %v403_v32, %s1776_s12 }
0x1011   :  { %v961_v33 = vpop.permute.xlu0 %960 }
0x1012   :  { %v2037_v35 = vmul.f32 %v1745_v25, %v961_v33 }
0x1014   :  { %980 = vrot.lane.b32.xlu1 %v2037_v35, %s1776_s12 }
0x1015   :  { %v508_v36 = vpop.permute.xlu0 %507 }
0x1016   :  { %v510_v37 = vsub.f32 %v1969_v12, %v508_v36 }
0x1018   :  { %512 = vrot.lane.b32.xlu1 %v510_v37, %s1776_s12 }
0x1086   :  { %v981_v38 = vpop.permute.xlu1 %980 }
0x1087   :  { %1586 = vmatmul.mubr.msk.f32.vlgmr.msra.gmra.mrb[8].mxu1 %vm54_vm1, %v981_v38  ;;  %v1387_v38 = vmul.f32 -1.442695, %v274_v22 }
0x1088   :  { %1607 = vmatprep.mubr.msk.f32.mxu1 %vm1773_vm0, %v1774_v4 }
0x108a   :  { %v513_v39 = vpop.permute.xlu1 %512 }
0x108b   :  { %v515_v40 = vmul.f32 %v1391_v57, %v513_v39 }
0x108d   :  { %v516_v41 = vadd.f32 %v515_v40, %v403_v32 }
0x108f   :  { %622 = vrot.lane.b32.xlu0 %v516_v41, %s1776_s12 }
0x1101   :  { %v623_v42 = vpop.permute.xlu0 %622 }
0x1102   :  { %v625_v12 = vsub.f32 %v1984_v34, %v623_v42 }
0x1104   :  { %627 = vrot.lane.b32.xlu0 %v625_v12, %s1776_s12 }
0x115a   :  { %v1050_v44 = vpop.f32.mrb[8].mxu1 }
0x115b   :  { %v1054_v45 = vadd.f32 %v1050_v44, %v176_v43  ;;  %v1587_v46 = vpop.f32.mrb[9].mxu1 }
0x115d   :  { %1748 = vtanh.f32 %v1054_v45  ;;  %v1405_v34 = vmul.f32 -1.442695, %v1054_v45 }
0x115f   :  { %1750 = vpow2.f32 %v1405_v34  ;;  %v1406_v34 = vld [vmem:[%s2144_s2 + $0x30] sm:$0xff] }
0x1167   :  { %v1749_v47 = vpop.eup %1748 }
0x1168   :  { %1064 = vrot.lane.b32.xlu1 %v1749_v47, %s1775_s21  ;;  %v1211_v47 = vld [vmem:[%s2146_s8 + $0x20] sm:$0xff] }
0x1169   :  { %v1751_v58 = vpop.eup %1750 }
0x116a   :  { %v1058_v56 = vadd.f32 1.0, %v1751_v58 }
0x116c   :  { %1752 = vrcp.f32 %v1058_v56 }
0x1176   :  { %v628_v49 = vpop.permute.xlu0 %627  ;;  %v1753_v59 = vpop.eup %1752 }
0x1177   :  { %v630_v50 = vmul.f32 %v1394_v48, %v628_v49  ;;  %v1062_v1 = vmul.f32 %v1753_v59, %v957_v53  ;;  %v1212_v48 = vld [vmem:[%s2146_s8 + $0x28] sm:$0xff]  ;;  %v1213_v49 = vld [vmem:[%s2146_s8 + $0x30] sm:$0xff] }
0x1179   :  { %v631_v51 = vadd.f32 %v630_v50, %v516_v41  ;;  %v1684_v50 = vpack.c.bf16 %v1212_v48, %v1211_v47 }
0x117b   :  { %737 = vrot.lane.b32.xlu0 %v631_v51, %s1776_s12  ;;  %1685 = vmatpush3.bf16.msra.mxu1 %v1684_v50 }
0x117c   :  { %1686 = vmatprep.subr.bf16.mxu1 %v1772_v0 }
0x11da   :  { %v1065_v60 = vpop.permute.xlu1 %1064 }
0x11db   :  { %v1067_v61 = vmul.f32 %v1753_v59, %v1065_v60 }
0x11dd   :  { %1069 = vrot.lane.b32.xlu1 %v1067_v61, %s1775_s21  ;;  %v1207_v61 = vld [vmem:[%s2146_s8] sm:$0xff] }
0x11ed   :  { %v738_v62 = vpop.permute.xlu0 %737 }
0x11ee   :  { %v740_v63 = vsub.f32 %v2000_v52, %v738_v62  ;;  %v1208_v62 = vld [vmem:[%s2146_s8 + $0x8] sm:$0xff] }
0x11f0   :  { %742 = vrot.lane.b32.xlu0 %v740_v63, %s1776_s12  ;;  %v1690_v63 = vpack.c.bf16 %v1208_v62, %v1207_v61 }
0x124f   :  { %v1070_v2 = vpop.permute.xlu1 %1069 }
0x1250   :  { %v1072_v3 = vadd.f32 %v1070_v2, %v1062_v1 }
0x1252   :  { %1754 = vtanh.f32 %v1072_v3 }
0x125c   :  { %v1755_v5 = vpop.eup %1754 }
0x125d   :  { %1075 = vrot.lane.b32.xlu1 %v1755_v5, %s1775_s21  ;;  %v1210_v5 = vld [vmem:[%s2146_s8 + $0x18] sm:$0xff] }
0x1262   :  { %v743_v7 = vpop.permute.xlu0 %742 }
0x1263   :  { %v745_v8 = vmul.f32 %v1397_v6, %v743_v7 }
0x1265   :  { %v746_v9 = vadd.f32 %v745_v8, %v631_v51  ;;  %v1214_v51 = vld [vmem:[%s2146_s8 + $0x38] sm:$0xff] }
0x1266   :  { %v1687_v58 = vpack.c.bf16 %v1214_v51, %v1213_v49 }
0x1267   :  { %852 = vrot.lane.b32.xlu0 %v746_v9, %s1776_s12 }
0x1268   :  { %1688 = vmatpush3.bf16.msra.mxu1 %v1687_v58 }
0x12cf   :  { %v1076_v54 = vpop.permute.xlu1 %1075 }
0x12d0   :  { %v1078_v52 = vmul.f32 %v1753_v59, %v1076_v54 }
0x12d2   :  { %1095 = vrot.lane.b32.xlu1 %v1078_v52, %s1776_s12 }
0x12d9   :  { %v853_v10 = vpop.permute.xlu0 %852 }
0x12da   :  { %v855_v11 = vsub.f32 %v2016_v13, %v853_v10 }
0x12dc   :  { %857 = vrot.lane.b32.xlu1 %v855_v11, %s1776_s12 }
0x1344   :  { %v1096_v14 = vpop.permute.xlu1 %1095 }
0x1345   :  { %1597 = vmatmul.mubr.msk.f32.vlgmr.msra.gmra.mrb[14].mxu0 %vm54_vm1, %v1096_v14 }
0x1346   :  { %1618 = vmatprep.mubr.msk.f32.mxu0 %vm1773_vm0, %v1774_v4  ;;  %1691 = vmatpush3.bf16.msra.mxu0 %v1690_v63 }
0x1347   :  { %1692 = vmatprep.subr.bf16.mxu0 %v1772_v0 }
0x134e   :  { %v858_v16 = vpop.permute.xlu1 %857 }
0x134f   :  { %v860_v17 = vmul.f32 %v1400_v15, %v858_v16 }
0x1351   :  { %v861_v19 = vadd.f32 %v860_v17, %v746_v9 }
0x1353   :  { %967 = vrot.lane.b32.xlu0 %v861_v19, %s1776_s12 }
0x13c5   :  { %v968_v20 = vpop.permute.xlu0 %967 }
0x13c6   :  { %v970_v13 = vsub.f32 %v2037_v35, %v968_v20 }
0x13c8   :  { %972 = vrot.lane.b32.xlu1 %v970_v13, %s1776_s12 }
0x1418   :  { %v1165_v21 = vpop.f32.mrb[14].mxu0 }
0x1419   :  { %v1169_v24 = vadd.f32 %v1165_v21, %v181_v18  ;;  %v1598_v4 = vpop.f32.mrb[15].mxu0 }
0x141b   :  { %1756 = vtanh.f32 %v1169_v24  ;;  %v1408_v30 = vmul.f32 -1.442695, %v1169_v24 }
0x141c   :  { %1758 = vtanh.f32 %v274_v22 }
0x141d   :  { %1760 = vpow2.f32 %v1408_v30 }
0x1425   :  { %v1757_v25 = vpop.eup %1756 }
0x1426   :  { %1179 = vrot.lane.b32.xlu0 %v1757_v25, %s1775_s21  ;;  %v1759_v53 = vpop.eup %1758 }
0x1427   :  { %v1761_v31 = vpop.eup %1760 }
0x1428   :  { %v1173_v32 = vadd.f32 1.0, %v1761_v31 }
0x142a   :  { %1762 = vrcp.f32 %v1173_v32 }
0x142b   :  { %1764 = vpow2.f32 %v1387_v38 }
0x1434   :  { %v1763_v33 = vpop.eup %1762 }
0x1435   :  { %v1765_v57 = vpop.eup %1764  ;;  %v1177_v40 = vmul.f32 %v1763_v33, %v1072_v3  ;;  %v1209_v3 = vld [vmem:[%s2146_s8 + $0x10] sm:$0xff] }
0x1436   :  { %v280_v39 = vadd.f32 1.0, %v1765_v57  ;;  %v1693_v7 = vpack.c.bf16 %v1210_v5, %v1209_v3 }
0x1438   :  { %1766 = vrcp.f32 %v280_v39  ;;  %1694 = vmatpush3.bf16.msra.mxu0 %v1693_v7 }
0x143a   :  { %v973_v29 = vpop.permute.xlu1 %972 }
0x143b   :  { %v975_v26 = vmul.f32 %v1403_v28, %v973_v29 }
0x143d   :  { %v976_v55 = vadd.f32 %v975_v26, %v861_v19  ;;  %v1412_v19 = vld [vmem:[%s2147_s9] ss:$0 sm:$0xff] }
0x143f   :  { %1082 = vrot.lane.b32.xlu1 %v976_v55, %s1776_s12 }
0x1442   :  { %v1767_v43 = vpop.eup %1766 }
0x1443   :  { %285 = vrot.lane.b32.xlu1 %v1759_v53, %s1775_s21 }
0x1498   :  { %v1180_v23 = vpop.permute.xlu0 %1179 }
0x1499   :  { %v1182_v35 = vmul.f32 %v1763_v33, %v1180_v23 }
0x149b   :  { %1184 = vrot.lane.b32.xlu0 %v1182_v35, %s1775_s21 }
0x14b1   :  { %v1083_v36 = vpop.permute.xlu1 %1082 }
0x14b2   :  { %v1085_v37 = vsub.f32 %v1078_v52, %v1083_v36  ;;  %v1409_v52 = vld [vmem:[%s2144_s2 + $0x38] sm:$0xff] }
0x14b4   :  { %1087 = vrot.lane.b32.xlu0 %v1085_v37, %s1776_s12 }
0x14b5   :  { %v286_v41 = vpop.permute.xlu1 %285 }
0x14b6   :  { %v288_v44 = vmul.f32 %v1767_v43, %v286_v41 }
0x150d   :  { %v1185_v42 = vpop.permute.xlu0 %1184 }
0x150e   :  { %v1187_v12 = vadd.f32 %v1185_v42, %v1177_v40 }
0x1510   :  { %1768 = vtanh.f32 %v1187_v12 }
0x1511   :  { %1770 = vtanh.f32 %v288_v44 }
0x151a   :  { %v1769_v45 = vpop.eup %1768 }
0x151b   :  { %1190 = vrot.lane.b32.xlu1 %v1769_v45, %s1775_s21  ;;  %v1771_v46 = vpop.eup %1770 }
0x151f   :  { %291 = vrot.lane.b32.xlu1 %v1771_v46, %s1776_s12 }
0x1526   :  { %v1088_v56 = vpop.permute.xlu0 %1087 }
0x1527   :  { %v1090_v59 = vmul.f32 %v1406_v34, %v1088_v56 }
0x1529   :  { %v1091_v60 = vadd.f32 %v1090_v59, %v976_v55 }
0x152b   :  { %1197 = vrot.lane.b32.xlu0 %v1091_v60, %s1776_s12 }
0x158d   :  { %v1191_v1 = vpop.permute.xlu1 %1190 }
0x158e   :  { %v1193_v8 = vmul.f32 %v1763_v33, %v1191_v1 }
0x1591   :  { %v292_v2 = vpop.permute.xlu1 %291 }
0x1592   :  { %v294_v6 = vmul.f32 %v1767_v43, %v292_v2 }
0x1594   :  { %1216 = vrot.lane.b32.xlu1 %v294_v6, %s1776_s12 }
0x159d   :  { %v1198_v9 = vpop.permute.xlu0 %1197 }
0x159e   :  { %v1200_v54 = vsub.f32 %v1193_v8, %v1198_v9 }
0x15a0   :  { %1202 = vrot.lane.b32.xlu0 %v1200_v54, %s1776_s12 }
0x1606   :  { %v1217_v0 = vpop.permute.xlu1 %1216 }
0x1607   :  { %1608 = vmatmul.mubr.msk.f32.vlgmr.msra.gmra.mrb[10].mxu1 %vm54_vm1, %v1217_v0 }
0x1612   :  { %v1203_v10 = vpop.permute.xlu0 %1202 }
0x1613   :  { %v1205_v11 = vmul.f32 %v1409_v52, %v1203_v10 }
0x1615   :  { %v1206_v14 = vadd.f32 %v1205_v11, %v1091_v60 }
0x1617   :  { %1619 = vmatmul.mubr.msk.f32.vlgmr.msra.gmra.mrb[16].mxu0 %vm54_vm1, %v1206_v14 }
0x16da   :  { %v1286_v15 = vpop.f32.mrb[10].mxu1 }
0x16db   :  { %v1609_v16 = vpop.f32.mrb[11].mxu1 }
0x16ea   :  { %v1359_v17 = vpop.f32.mrb[16].mxu0 }
0x16eb   :  { %v1360_v20 = vadd.f32 %v1359_v17, %v1286_v15  ;;  %v1620_v13 = vpop.f32.mrb[17].mxu0 }
0x16ed   :  { %v1370_v18 = vadd.f32 %v1412_v19, %v1360_v20 }
0x16ef   :  { %1371 = vst [vmem:[%s2148_s10] sm:$0xff] %v1370_v18 }

</bundles_post_ra>
